<compile_context>
chip_gen: v6e
topology: v6e:2x2x1
jax: 0.10.0
libtpu: 0.0.40
codegen_flags: <defaults>
</compile_context>

<pallas_src>
import jax
import jax.numpy as jnp
import numpy as np
from jax.experimental import pallas as pl
from jax.experimental.pallas import tpu as pltpu

HIDDEN = 256


def valuenet_kernel(x_ref, w1_ref, b1_ref, w2_ref, b2_ref, w3_ref, b3_ref,
                    o_ref, h1_ref, h2_ref):
    # Layer 1: [TB, S](bf16) @ [S, 256](bf16) -> f32 acc, +bias, ReLU (f32 VPU)
    x = x_ref[...].astype(jnp.bfloat16)
    h1 = jnp.dot(x, w1_ref[...],
                 preferred_element_type=jnp.float32) + b1_ref[...]
    h1_ref[...] = jnp.maximum(h1, 0.0).astype(jnp.bfloat16)

    # Layer 2: [TB, 256](bf16) @ [256, 256](bf16) -> f32 acc, +bias, ReLU
    h2 = jnp.dot(h1_ref[...], w2_ref[...],
                 preferred_element_type=jnp.float32) + b2_ref[...]
    h2_ref[...] = jnp.maximum(h2, 0.0).astype(jnp.bfloat16)

    # Layer 3: [TB, 256](bf16) @ [256, A_pad](bf16) -> f32, +bias (no act).
    # w3/b3 are lane-padded to a multiple of 128; the static slice drops the
    # padded lanes so only action_dim columns are written back to HBM.
    y = jnp.dot(h2_ref[...], w3_ref[...],
                preferred_element_type=jnp.float32) + b3_ref[...]
    o_ref[...] = y[:, :o_ref.shape[1]].astype(o_ref.dtype)


def _round_up(x, m):
    return ((x + m - 1) // m) * m


def _cdiv(a, b):
    return (a + b - 1) // b


def _pick_batch_tiling(B, max_tile=2048):
    """Pick (tile_b, n_tiles).  tile_b is a multiple of 16.

    Tiny batches (<=256) use a single padded-to-16 tile.  Larger batches use
    tiles up to `max_tile` rows with an even number of >=2 grid steps so the
    'parallel' batch axis shards across both v7x TensorCores, while keeping
    padding waste small (16-row granularity instead of 256)."""
    if B <= 256:
        tile_b = _round_up(max(B, 16), 16)
        return tile_b, 1
    n_tiles = max(2, _cdiv(B, max_tile))
    n_tiles += n_tiles % 2          # even step count -> both v7x TCs busy
    tile_b = _round_up(_cdiv(B, n_tiles), 16)
    return tile_b, n_tiles


def valuenet_forward(state, params, *, tile_b=None):
    """state: [B, state_dim] float32; params: bf16 weights, f32 biases."""
    w1, b1, w2, b2, w3, b3 = (params["w1"], params["b1"], params["w2"],
                              params["b2"], params["w3"], params["b3"])
    B, S = state.shape
    H = w1.shape[1]
    A = w3.shape[1]

    # --- Lane-dense layer-3 matmul RHS: pad w3/b3 to a multiple of 128. ---
    A_pad = _round_up(A, 128)
    if A_pad != A:
        w3p = jnp.zeros((H, A_pad), w3.dtype).at[:, :A].set(w3)
        b3p = jnp.zeros((1, A_pad), b3.dtype).at[:, :A].set(b3)
    else:
        w3p, b3p = w3, b3

    # --- Batch tiling (large tiles, even >=2-step grid for big batches). ---
    if tile_b is None:
        tile_b, n_tiles = _pick_batch_tiling(B)
    else:
        tile_b = _round_up(max(tile_b, 16), 16)
        n_tiles = _cdiv(B, tile_b)
    B_pad = tile_b * n_tiles
    if B_pad != B:
        state_p = jnp.zeros((B_pad, S), state.dtype).at[:B, :].set(state)
    else:
        state_p = state

    flops = 2 * B_pad * (S * H + H * H + H * A_pad)
    bytes_accessed = int(
        B_pad * S * 4                          # x (f32)
        + (w1.size + w2.size + w3p.size) * 2   # bf16 weights (fetched once)
        + (b1.size + b2.size + b3p.size) * 4   # f32 biases
        + B_pad * A * 4)                       # f32 output (unpadded lanes)

    out = pl.pallas_call(
        valuenet_kernel,
        out_shape=jax.ShapeDtypeStruct((B_pad, A), jnp.float32),
        grid_spec=pltpu.PrefetchScalarGridSpec(
            num_scalar_prefetch=0,
            grid=(n_tiles,),
            in_specs=[
                pl.BlockSpec((tile_b, S), lambda i: (i, 0)),   # x tile
                # TODO(synk): pipeline_mode=pl.Buffered(1) on the six resident
                # operands would reclaim their second buffer; skipped because
                # the whole working set (~3 MB at tile_b=2048) is already far
                # below the 16 MiB v5e scoped-VMEM default.
                pl.BlockSpec((S, H), lambda i: (0, 0)),        # w1 (resident)
                pl.BlockSpec((1, H), lambda i: (0, 0)),        # b1 (resident)
                pl.BlockSpec((H, H), lambda i: (0, 0)),        # w2 (resident)
                pl.BlockSpec((1, H), lambda i: (0, 0)),        # b2 (resident)
                pl.BlockSpec((H, A_pad), lambda i: (0, 0)),    # w3 (resident)
                pl.BlockSpec((1, A_pad), lambda i: (0, 0)),    # b3 (resident)
            ],
            out_specs=pl.BlockSpec((tile_b, A), lambda i: (i, 0)),
            scratch_shapes=[
                pltpu.VMEM((tile_b, H), jnp.bfloat16),  # h1 activations
                pltpu.VMEM((tile_b, H), jnp.bfloat16),  # h2 activations
            ],
        ),
        compiler_params=pltpu.CompilerParams(
            dimension_semantics=("parallel",)),
        cost_estimate=pl.CostEstimate(flops=flops, transcendentals=0,
                                      bytes_accessed=bytes_accessed),
    )(state_p, w1, b1, w2, b2, w3p, b3p)

    # Strip batch padding only (output lanes are already exactly action_dim).
    return out[:B] if B_pad != B else out


def init_params(key, state_dim, action_dim, edge=0.003):
    """Synthetic init mirroring nn.Linear defaults + the uniform(-edge, edge)
    override on the last layer. Weights stored [in, out] in bf16 (MXU path),
    biases stored [1, out] in f32."""
    k1, k2, k3, k4, k5, k6 = jax.random.split(key, 6)

    def uniform(k, shape, bound):
        return jax.random.uniform(k, shape, jnp.float32, -bound, bound)

    bound1 = 1.0 / np.sqrt(state_dim)
    bound2 = 1.0 / np.sqrt(HIDDEN)
    params = {
        "w1": uniform(k1, (state_dim, HIDDEN), bound1).astype(jnp.bfloat16),
        "b1": uniform(k2, (1, HIDDEN), bound1),
        "w2": uniform(k3, (HIDDEN, HIDDEN), bound2).astype(jnp.bfloat16),
        "b2": uniform(k4, (1, HIDDEN), bound2),
        "w3": uniform(k5, (HIDDEN, action_dim), edge).astype(jnp.bfloat16),
        "b3": uniform(k6, (1, action_dim), edge),
    }
    return params


def valuenet_reference(state, params):
    """Pure-JAX f32 reference using the (bf16-quantized) weights upcast."""
    w1 = params["w1"].astype(jnp.float32)
    w2 = params["w2"].astype(jnp.float32)
    w3 = params["w3"].astype(jnp.float32)
    h1 = jnp.maximum(state @ w1 + params["b1"], 0.0)
    h2 = jnp.maximum(h1 @ w2 + params["b2"], 0.0)
    return h2 @ w3 + params["b3"]


if __name__ == "__main__":
    key = jax.random.PRNGKey(0)
    state_dim, action_dim = 8, 4

    kp, kx1, kx2 = jax.random.split(key, 3)
    params = init_params(kp, state_dim, action_dim, edge=0.003)

    # Tiny batch (single-tile path).
    state_small = jax.random.normal(kx1, (2, state_dim), jnp.float32)
    out_small = jax.block_until_ready(valuenet_forward(state_small, params))
    assert out_small.shape == (2, action_dim)
    ref_small = valuenet_reference(state_small, params)
    # bf16 activation casts inside the kernel -> relaxed tolerance (documented).
    np.testing.assert_allclose(np.asarray(out_small), np.asarray(ref_small),
                               rtol=2e-2, atol=2e-2)

    # Moderate batch (multi-step grid + batch-pad path: 272 -> 2 tiles of 144).
    state_big = jax.random.normal(kx2, (272, state_dim), jnp.float32)
    out_big = jax.block_until_ready(valuenet_forward(state_big, params))
    assert out_big.shape == (272, action_dim)
    ref_big = valuenet_reference(state_big, params)
    np.testing.assert_allclose(np.asarray(out_big), np.asarray(ref_big),
                               rtol=2e-2, atol=2e-2)

    print("KERNEL_OK")
</pallas_src>

<mosaic_0001>
module attributes {stable_mosaic.version = 11 : i64} {
  func.func @valuenet_kernel(%arg0: i32, %arg1: memref<16x8xf32, #tpu.memory_space<vmem>>, %arg2: memref<8x256xbf16, #tpu.memory_space<vmem>>, %arg3: memref<1x256xf32, #tpu.memory_space<vmem>>, %arg4: memref<256x256xbf16, #tpu.memory_space<vmem>>, %arg5: memref<1x256xf32, #tpu.memory_space<vmem>>, %arg6: memref<256x128xbf16, #tpu.memory_space<vmem>>, %arg7: memref<1x128xf32, #tpu.memory_space<vmem>>, %arg8: memref<16x4xf32, #tpu.memory_space<vmem>>, %arg9: memref<16x256xbf16, #tpu.memory_space<vmem>>, %arg10: memref<16x256xbf16, #tpu.memory_space<vmem>>) attributes {dimension_semantics = [#tpu.dimension_semantics<parallel>], iteration_bounds = array<i64: 1>, scalar_prefetch = 0 : i64, scratch_operands = 2 : i64, tpu.core_type = #tpu.core_type<tc>, window_params = [{transform_indices = @transform_0, window_bounds = array<i64: 16, 8>}, {pipeline_mode = #tpu.pipeline_mode<synchronous>, transform_indices = @transform_1, window_bounds = array<i64: 8, 256>}, {pipeline_mode = #tpu.pipeline_mode<synchronous>, transform_indices = @transform_2, window_bounds = array<i64: 1, 256>}, {pipeline_mode = #tpu.pipeline_mode<synchronous>, transform_indices = @transform_3, window_bounds = array<i64: 256, 256>}, {pipeline_mode = #tpu.pipeline_mode<synchronous>, transform_indices = @transform_4, window_bounds = array<i64: 1, 256>}, {pipeline_mode = #tpu.pipeline_mode<synchronous>, transform_indices = @transform_5, window_bounds = array<i64: 256, 128>}, {pipeline_mode = #tpu.pipeline_mode<synchronous>, transform_indices = @transform_6, window_bounds = array<i64: 1, 128>}, {transform_indices = @transform_7, window_bounds = array<i64: 16, 4>}]} {
    %c0 = arith.constant 0 : index
    %c0_0 = arith.constant 0 : index
    %0 = vector.load %arg1[%c0, %c0_0] : memref<16x8xf32, #tpu.memory_space<vmem>>, vector<16x8xf32>
    %1 = arith.truncf %0 : vector<16x8xf32> to vector<16x8xbf16>
    %c0_1 = arith.constant 0 : index
    %c0_2 = arith.constant 0 : index
    %2 = vector.load %arg2[%c0_1, %c0_2] : memref<8x256xbf16, #tpu.memory_space<vmem>>, vector<8x256xbf16>
    %cst = arith.constant dense<0.000000e+00> : vector<16x256xf32>
    %3 = tpu.matmul %1, %2, %cst {dimension_numbers = #tpu.dot_dimension_numbers<[1], [0], [0], [1], [0, 0, 1, 1], [], []>} : vector<16x8xbf16>, vector<8x256xbf16>, vector<16x256xf32> -> vector<16x256xf32>
    %c0_3 = arith.constant 0 : index
    %c0_4 = arith.constant 0 : index
    %4 = vector.load %arg3[%c0_3, %c0_4] : memref<1x256xf32, #tpu.memory_space<vmem>>, vector<1x256xf32>
    %5 = vector.broadcast %4 : vector<1x256xf32> to vector<16x256xf32>
    %6 = arith.addf %3, %5 : vector<16x256xf32>
    %cst_5 = arith.constant 0.000000e+00 : f32
    %7 = vector.broadcast %cst_5 : f32 to vector<16x256xf32>
    %8 = arith.maximumf %6, %7 : vector<16x256xf32>
    %9 = arith.truncf %8 : vector<16x256xf32> to vector<16x256xbf16>
    %c0_6 = arith.constant 0 : index
    %c0_7 = arith.constant 0 : index
    %10 = vector.load %arg9[%c0_6, %c0_7] : memref<16x256xbf16, #tpu.memory_space<vmem>>, vector<16x256xbf16>
    tpu.vector_store %arg9[%c0_6, %c0_7], %9 {strides = array<i32>} : memref<16x256xbf16, #tpu.memory_space<vmem>>, vector<16x256xbf16>,
    %c0_8 = arith.constant 0 : index
    %c0_9 = arith.constant 0 : index
    %11 = vector.load %arg9[%c0_8, %c0_9] : memref<16x256xbf16, #tpu.memory_space<vmem>>, vector<16x256xbf16>
    %c0_10 = arith.constant 0 : index
    %c0_11 = arith.constant 0 : index
    %12 = vector.load %arg4[%c0_10, %c0_11] : memref<256x256xbf16, #tpu.memory_space<vmem>>, vector<256x256xbf16>
    %cst_12 = arith.constant dense<0.000000e+00> : vector<16x256xf32>
    %13 = tpu.matmul %11, %12, %cst_12 {dimension_numbers = #tpu.dot_dimension_numbers<[1], [0], [0], [1], [0, 0, 1, 1], [], []>} : vector<16x256xbf16>, vector<256x256xbf16>, vector<16x256xf32> -> vector<16x256xf32>
    %c0_13 = arith.constant 0 : index
    %c0_14 = arith.constant 0 : index
    %14 = vector.load %arg5[%c0_13, %c0_14] : memref<1x256xf32, #tpu.memory_space<vmem>>, vector<1x256xf32>
    %15 = vector.broadcast %14 : vector<1x256xf32> to vector<16x256xf32>
    %16 = arith.addf %13, %15 : vector<16x256xf32>
    %cst_15 = arith.constant 0.000000e+00 : f32
    %17 = vector.broadcast %cst_15 : f32 to vector<16x256xf32>
    %18 = arith.maximumf %16, %17 : vector<16x256xf32>
    %19 = arith.truncf %18 : vector<16x256xf32> to vector<16x256xbf16>
    %c0_16 = arith.constant 0 : index
    %c0_17 = arith.constant 0 : index
    %20 = vector.load %arg10[%c0_16, %c0_17] : memref<16x256xbf16, #tpu.memory_space<vmem>>, vector<16x256xbf16>
    tpu.vector_store %arg10[%c0_16, %c0_17], %19 {strides = array<i32>} : memref<16x256xbf16, #tpu.memory_space<vmem>>, vector<16x256xbf16>,
    %c0_18 = arith.constant 0 : index
    %c0_19 = arith.constant 0 : index
    %21 = vector.load %arg10[%c0_18, %c0_19] : memref<16x256xbf16, #tpu.memory_space<vmem>>, vector<16x256xbf16>
    %c0_20 = arith.constant 0 : index
    %c0_21 = arith.constant 0 : index
    %22 = vector.load %arg6[%c0_20, %c0_21] : memref<256x128xbf16, #tpu.memory_space<vmem>>, vector<256x128xbf16>
    %cst_22 = arith.constant dense<0.000000e+00> : vector<16x128xf32>
    %23 = tpu.matmul %21, %22, %cst_22 {dimension_numbers = #tpu.dot_dimension_numbers<[1], [0], [0], [1], [0, 0, 1, 1], [], []>} : vector<16x256xbf16>, vector<256x128xbf16>, vector<16x128xf32> -> vector<16x128xf32>
    %c0_23 = arith.constant 0 : index
    %c0_24 = arith.constant 0 : index
    %24 = vector.load %arg7[%c0_23, %c0_24] : memref<1x128xf32, #tpu.memory_space<vmem>>, vector<1x128xf32>
    %25 = vector.broadcast %24 : vector<1x128xf32> to vector<16x128xf32>
    %26 = arith.addf %23, %25 : vector<16x128xf32>
    %27 = vector.extract_strided_slice %26 {offsets = [0, 0], sizes = [16, 4], strides = [1, 1]} : vector<16x128xf32> to vector<16x4xf32>
    %c0_25 = arith.constant 0 : index
    %c0_26 = arith.constant 0 : index
    %28 = vector.load %arg8[%c0_25, %c0_26] : memref<16x4xf32, #tpu.memory_space<vmem>>, vector<16x4xf32>
    tpu.vector_store %arg8[%c0_25, %c0_26], %27 {strides = array<i32>} : memref<16x4xf32, #tpu.memory_space<vmem>>, vector<16x4xf32>,
    return
  }
  func.func @transform_0(%arg0: i32) -> (i32, i32) {
    %c0_i32 = arith.constant 0 : i32
    %c0_i32_0 = arith.constant 0 : i32
    return %arg0, %c0_i32 : i32, i32
  }
  func.func @transform_1(%arg0: i32) -> (i32, i32) {
    %c0_i32 = arith.constant 0 : i32
    %c0_i32_0 = arith.constant 0 : i32
    %c0_i32_1 = arith.constant 0 : i32
    return %c0_i32, %c0_i32_0 : i32, i32
  }
  func.func @transform_2(%arg0: i32) -> (i32, i32) {
    %c0_i32 = arith.constant 0 : i32
    %c0_i32_0 = arith.constant 0 : i32
    %c0_i32_1 = arith.constant 0 : i32
    return %c0_i32, %c0_i32_0 : i32, i32
  }
  func.func @transform_3(%arg0: i32) -> (i32, i32) {
    %c0_i32 = arith.constant 0 : i32
    %c0_i32_0 = arith.constant 0 : i32
    %c0_i32_1 = arith.constant 0 : i32
    return %c0_i32, %c0_i32_0 : i32, i32
  }
  func.func @transform_4(%arg0: i32) -> (i32, i32) {
    %c0_i32 = arith.constant 0 : i32
    %c0_i32_0 = arith.constant 0 : i32
    %c0_i32_1 = arith.constant 0 : i32
    return %c0_i32, %c0_i32_0 : i32, i32
  }
  func.func @transform_5(%arg0: i32) -> (i32, i32) {
    %c0_i32 = arith.constant 0 : i32
    %c0_i32_0 = arith.constant 0 : i32
    %c0_i32_1 = arith.constant 0 : i32
    return %c0_i32, %c0_i32_0 : i32, i32
  }
  func.func @transform_6(%arg0: i32) -> (i32, i32) {
    %c0_i32 = arith.constant 0 : i32
    %c0_i32_0 = arith.constant 0 : i32
    %c0_i32_1 = arith.constant 0 : i32
    return %c0_i32, %c0_i32_0 : i32, i32
  }
  func.func @transform_7(%arg0: i32) -> (i32, i32) {
    %c0_i32 = arith.constant 0 : i32
    %c0_i32_0 = arith.constant 0 : i32
    return %arg0, %c0_i32 : i32, i32
  }
}

</mosaic_0001>

<bundles_post_ra>
// kernel: tpu_custom_call.1
= control target key start
LH: loop header
LB: loop body
LE: loop exit
PB: predicated region body
PF: predicated region fallthrough
CT: control target
= control target key end

     0   :  { %12 = vsyncpa [#allocation5], 0  ;;  %s907_s0 = inlined_call_operand.vmem [shape: f32[16,8], index: 0, kind: input, shape index: {}]   ;;  %s908_s1 = inlined_call_operand.vmem [shape: bf16[8,256], index: 1, kind: input, shape index: {}]   ;;  %s909_s2 = inlined_call_operand.vmem [shape: f32[1,256], index: 2, kind: input, shape index: {}]   ;;  %s910_s3 = inlined_call_operand.hbm [shape: bf16[256,256], index: 3, kind: input, shape index: {}]   ;;  %s911_s4 = inlined_call_operand.vmem [shape: f32[1,256], index: 4, kind: input, shape index: {}]   ;;  %s912_s5 = inlined_call_operand.hbm [shape: bf16[256,128], index: 5, kind: input, shape index: {}]   ;;  %s913_s6 = inlined_call_operand.vmem [shape: f32[1,128], index: 6, kind: input, shape index: {}]   ;;  %s914_s7 = inlined_call_operand.vmem [shape: f32[16,4], index: 7, kind: output, shape index: {}]  }
   0x1   :  { %13 = vsyncpa [#allocation7], 0  ;;  %s830_s24 = smov [#allocation4]  }
   0x2   :  { %s25_s25 = sshll.u32 %s830_s24, 4  ;;  %s26_s25 = int_to_ptr.vmem [resolvable:$true] %s25_s25 }
   0x3   :  { %s794_s26 = scalar_lea.vmem %s26_s25, 4096  ;;  %p799_p1 = scmp.lt.s32.totalorder %s26_s25, %s26_s25 }
   0x4   :  { %p795_p0 = scmp.ne.s32.totalorder %s26_s25, %s794_s26  ;;  %p800_p2 = scmp.lt.s32.totalorder %s794_s26, %s794_s26 }
   0x6   :  { %p801_p3 = por %p800_p2, %p799_p1 }
   0x8   :  { %p802_p4 = pnand %p801_p3, %p795_p0 }
   0xa   :  { %805 = shalt.err (!%p802_p4)
}
   0xb   :  { %s831_s27 = smov 128   ;;  %s832_s28 = smov 8  }
   0xc   :  { %31 = dma.hbm_to_vmem [thread:$0]  %s910_s3, 4096, %s26_s25, [#allocation5], %s831_s27, %s831_s27, %s832_s28  }
   0xd   :  { %s833_s8 = smov [#allocation6]  }
   0xe   :  { %s39_s9 = sshll.u32 %s833_s8, 4  ;;  %s40_s9 = int_to_ptr.vmem [resolvable:$true] %s39_s9 }
   0xf   :  { %s814_s10 = scalar_lea.vmem %s40_s9, 2048  ;;  %p819_p6 = scmp.lt.s32.totalorder %s40_s9, %s40_s9 }
  0x10   :  { %p815_p5 = scmp.ne.s32.totalorder %s40_s9, %s814_s10  ;;  %p820_p7 = scmp.lt.s32.totalorder %s814_s10, %s814_s10 }
  0x12   :  { %p821_p8 = por %p820_p7, %p819_p6 }
  0x14   :  { %p822_p9 = pnand %p821_p8, %p815_p5 }
  0x16   :  { %825 = shalt.err (!%p822_p9)
}
  0x17   :  { %s834_s11 = smov 64   ;;  %s835_s12 = smov 4  }
  0x18   :  { %45 = dma.hbm_to_vmem [thread:$0]  %s912_s5, 2048, %s40_s9, [#allocation7], %s834_s11, %s834_s11, %s835_s12  }
  0x19   :  { %826 = dma.done.wait [#allocation5], 4096  }
  0x1a   :  { %827 = vsyncadd [#allocation5], 4294963200 }
  0x1b   :  { %828 = dma.done.wait [#allocation7], 2048  }
  0x1c   :  { %829 = vsyncadd [#allocation7], 4294965248  ;;  %v836_v0 = vmov 0   ;;  %v58_v1 = vld [vmem:[%s908_s1] sm:$0xff]  ;;  %vm80_vm0 = vcmask 1043456   ;;  %v56_v3 = vld [vmem:[%s907_s0 + $0x8] sm:$0xff]  ;;  %v61_v50 = vlaneseq }
  0x1d   :  { %119 = vmatprep.mubr.bf16.mxu0 %v836_v0  ;;  %v55_v2 = vld [vmem:[%s907_s0] sm:$0xff]  ;;  %v623_v4 = vcombine.high %v58_v1, %v58_v1  ;;  %v622_v5 = vcombine.low %v58_v1, %v58_v1  ;;  %v722_v6 = vld [vmem:[#allocation4 + $0x74] ss:$8 sps:$4 sm:$0xff]   ;;  %v724_v7 = vld [vmem:[#allocation4 + $0x70] ss:$8 sps:$4 sm:$0xff]   ;;  %vm76_vm1 = vcmask 64512  }
  0x1e   :  { %v57_v9 = vpack.c.bf16 %v56_v3, %v55_v2  ;;  %364 = vmatprep.subr.bf16.mxu1 %v722_v6  ;;  %v725_v10 = vld [vmem:[#allocation4 + $0x64] ss:$8 sps:$4 sm:$0xff]   ;;  %v727_v11 = vld [vmem:[#allocation4 + $0x60] ss:$8 sps:$4 sm:$0xff]   ;;  %v728_v12 = vld [vmem:[#allocation4 + $0x54] ss:$8 sps:$4 sm:$0xff]  }
  0x1f   :  { %624 = vmatprep.subr.msk.bf16.mxu0 %vm80_vm0, %v623_v4  ;;  %v82_v8 = vsel %vm80_vm0, %v622_v5, 0  ;;  %365 = vmatpush1.bf16.msra.mxu1 %v724_v7  ;;  %v730_v13 = vld [vmem:[#allocation4 + $0x50] ss:$8 sps:$4 sm:$0xff]   ;;  %v731_v14 = vld [vmem:[#allocation4 + $0x44] ss:$8 sps:$4 sm:$0xff]   ;;  %v62_v51 = vshrl.u32 %v61_v50, 7 }
  0x20   :  { %102 = vmatpush1.bf16.msra.mxu0 %v82_v8  ;;  %366 = vmatprep.subr.bf16.mxu1 %v725_v10  ;;  %v733_v15 = vld [vmem:[#allocation4 + $0x40] ss:$8 sps:$4 sm:$0xff]   ;;  %v734_v16 = vld [vmem:[#allocation4 + $0x34] ss:$8 sps:$4 sm:$0xff]   ;;  %v736_v17 = vld [vmem:[#allocation4 + $0x30] ss:$8 sps:$4 sm:$0xff]  }
  0x21   :  { %v737_v18 = vld [vmem:[#allocation4 + $0x24] ss:$8 sps:$4 sm:$0xff]   ;;  %v739_v19 = vld [vmem:[#allocation4 + $0x20] ss:$8 sps:$4 sm:$0xff]   ;;  %v740_v20 = vld [vmem:[#allocation4 + $0x14] ss:$8 sps:$4 sm:$0xff]  }
  0x22   :  { %v742_v21 = vld [vmem:[#allocation4 + $0x10] ss:$8 sps:$4 sm:$0xff]   ;;  %v743_v22 = vld [vmem:[#allocation4 + $0x4] ss:$8 sps:$4 sm:$0xff]   ;;  %v745_v23 = vld [vmem:[#allocation4] ss:$8 sps:$4 sm:$0xff]  }
  0x23   :  { %625 = vmatmul.mubr.msk.bf16.vlgmr.msra.gmra.mxu0 %vm76_vm1, %v57_v9  ;;  %367 = vmatpush1.bf16.msra.mxu1 %v727_v11  ;;  %v746_v24 = vld [vmem:[#allocation4 + $0xf4] ss:$8 sps:$4 sm:$0xff]   ;;  %v748_v25 = vld [vmem:[#allocation4 + $0xf0] ss:$8 sps:$4 sm:$0xff]   ;;  %v749_v26 = vld [vmem:[#allocation4 + $0xe4] ss:$8 sps:$4 sm:$0xff]  }
  0x24   :  { %368 = vmatprep.subr.bf16.mxu1 %v728_v12  ;;  %v751_v27 = vld [vmem:[#allocation4 + $0xe0] ss:$8 sps:$4 sm:$0xff]   ;;  %v752_v28 = vld [vmem:[#allocation4 + $0xd4] ss:$8 sps:$4 sm:$0xff]   ;;  %v754_v29 = vld [vmem:[#allocation4 + $0xd0] ss:$8 sps:$4 sm:$0xff]  }
  0x25   :  { %v755_v30 = vld [vmem:[#allocation4 + $0xc4] ss:$8 sps:$4 sm:$0xff]   ;;  %v757_v31 = vld [vmem:[#allocation4 + $0xc0] ss:$8 sps:$4 sm:$0xff]   ;;  %v758_v32 = vld [vmem:[#allocation4 + $0xb4] ss:$8 sps:$4 sm:$0xff]  }
  0x26   :  { %v760_v33 = vld [vmem:[#allocation4 + $0xb0] ss:$8 sps:$4 sm:$0xff]   ;;  %v761_v34 = vld [vmem:[#allocation4 + $0xa4] ss:$8 sps:$4 sm:$0xff]   ;;  %v763_v35 = vld [vmem:[#allocation4 + $0xa0] ss:$8 sps:$4 sm:$0xff]  }
  0x27   :  { %369 = vmatpush1.bf16.msra.mxu1 %v730_v13  ;;  %v764_v36 = vld [vmem:[#allocation4 + $0x94] ss:$8 sps:$4 sm:$0xff]   ;;  %v766_v37 = vld [vmem:[#allocation4 + $0x90] ss:$8 sps:$4 sm:$0xff]   ;;  %v767_v38 = vld [vmem:[#allocation4 + $0x84] ss:$8 sps:$4 sm:$0xff]  }
  0x28   :  { %370 = vmatprep.subr.bf16.mxu1 %v731_v14  ;;  %v769_v39 = vld [vmem:[#allocation4 + $0x80] ss:$8 sps:$4 sm:$0xff]   ;;  %v770_v40 = vld [vmem:[#allocation6 + $0x78] sm:$0xff]   ;;  %v772_v42 = vld [vmem:[#allocation6 + $0x70] sm:$0xff]   ;;  %v67_v52 = vsub.s32 1, %v62_v51  ;;  %v63_v53 = vsub.s32 0, %v62_v51 }
  0x29   :  { %v771_v41 = vld [vmem:[#allocation6 + $0x38] sm:$0xff]   ;;  %691 = vmatprep.subr.bf16.mxu0 %v770_v40  ;;  %v773_v43 = vld [vmem:[#allocation6 + $0x30] sm:$0xff]   ;;  %v774_v44 = vld [vmem:[#allocation6 + $0x68] sm:$0xff]   ;;  %vm613_vm2 = vcmask 31744  }
  0x2a   :  { %692 = vmatpush3.bf16.msra.mxu0 %v771_v41  ;;  %v775_v45 = vld [vmem:[#allocation6 + $0x28] sm:$0xff]   ;;  %v776_v46 = vld [vmem:[#allocation6 + $0x60] sm:$0xff]   ;;  %v778_v48 = vld [vmem:[#allocation6 + $0x58] sm:$0xff]  }
  0x2b   :  { %371 = vmatpush1.bf16.msra.mxu1 %v733_v15  ;;  %693 = vmatprep.subr.bf16.mxu0 %v772_v42  ;;  %v777_v47 = vld [vmem:[#allocation6 + $0x20] sm:$0xff]   ;;  %v779_v49 = vld [vmem:[#allocation6 + $0x18] sm:$0xff]   ;;  %v780_v7 = vld [vmem:[#allocation6 + $0x50] sm:$0xff]  }
  0x2c   :  { %372 = vmatprep.subr.bf16.mxu1 %v734_v16  ;;  %v59_v54 = vld [vmem:[%s909_s2] sm:$0x3]  ;;  %v781_v8 = vld [vmem:[#allocation6 + $0x10] sm:$0xff]   ;;  %v782_v9 = vld [vmem:[#allocation6 + $0x48] sm:$0xff]  }
  0x2d   :  { %v68_v56 = vrot.slane %v59_v54, %v67_v52  ;;  %v64_v57 = vrot.slane %v59_v54, %v63_v53  ;;  %v783_v10 = vld [vmem:[#allocation6 + $0x8] sm:$0xff]   ;;  %v784_v11 = vld [vmem:[#allocation6 + $0x40] sm:$0xff]  }
  0x2e   :  { %694 = vmatpush3.bf16.msra.mxu0 %v773_v43  ;;  %v785_v12 = vld [vmem:[#allocation6] sm:$0xff]  }
  0x2f   :  { %373 = vmatpush1.bf16.msra.mxu1 %v736_v17  ;;  %695 = vmatprep.subr.bf16.mxu0 %v774_v44  ;;  %v182_v13 = vld [vmem:[%s911_s4] sm:$0x3] }
  0x30   :  { %374 = vmatprep.subr.bf16.mxu1 %v737_v18  ;;  %v191_v15 = vrot.slane %v182_v13, %v67_v52  ;;  %v187_v16 = vrot.slane %v182_v13, %v63_v53 }
  0x32   :  { %696 = vmatpush3.bf16.msra.mxu0 %v775_v45 }
  0x33   :  { %375 = vmatpush1.bf16.msra.mxu1 %v739_v19  ;;  %697 = vmatprep.subr.bf16.mxu0 %v776_v46 }
  0x34   :  { %376 = vmatprep.subr.bf16.mxu1 %v740_v20 }
  0x36   :  { %698 = vmatpush3.bf16.msra.mxu0 %v777_v47 }
  0x37   :  { %377 = vmatpush1.bf16.msra.mxu1 %v742_v21  ;;  %699 = vmatprep.subr.bf16.mxu0 %v778_v48 }
  0x38   :  { %378 = vmatprep.subr.bf16.mxu1 %v743_v22 }
  0x3a   :  { %700 = vmatpush3.bf16.msra.mxu0 %v779_v49 }
  0x3b   :  { %379 = vmatpush1.bf16.msra.mxu1 %v745_v23  ;;  %701 = vmatprep.subr.bf16.mxu0 %v780_v7 }
  0x3c   :  { %380 = vmatprep.subr.bf16.mxu1 %v746_v24 }
  0x3e   :  { %702 = vmatpush3.bf16.msra.mxu0 %v781_v8 }
  0x3f   :  { %381 = vmatpush2.bf16.msra.mxu1 %v748_v25  ;;  %703 = vmatprep.subr.bf16.mxu0 %v782_v9 }
  0x40   :  { %382 = vmatprep.subr.bf16.mxu1 %v749_v26 }
  0x42   :  { %704 = vmatpush3.bf16.msra.mxu0 %v783_v10 }
  0x43   :  { %383 = vmatpush2.bf16.msra.mxu1 %v751_v27  ;;  %705 = vmatprep.subr.bf16.mxu0 %v784_v11 }
  0x44   :  { %384 = vmatprep.subr.bf16.mxu1 %v752_v28 }
  0x46   :  { %706 = vmatpush3.bf16.msra.mxu0 %v785_v12 }
  0x47   :  { %385 = vmatpush2.bf16.msra.mxu1 %v754_v29 }
  0x48   :  { %386 = vmatprep.subr.bf16.mxu1 %v755_v30 }
  0x4b   :  { %387 = vmatpush2.bf16.msra.mxu1 %v757_v31  ;;  %v664_v31 = vld [vmem:[%s913_s6] ss:$0 sm:$0xff] }
  0x4c   :  { %388 = vmatprep.subr.bf16.mxu1 %v758_v32 }
  0x4f   :  { %389 = vmatpush2.bf16.msra.mxu1 %v760_v33 }
  0x50   :  { %390 = vmatprep.subr.bf16.mxu1 %v761_v34 }
  0x53   :  { %391 = vmatpush2.bf16.msra.mxu1 %v763_v35 }
  0x54   :  { %392 = vmatprep.subr.bf16.mxu1 %v764_v36 }
  0x57   :  { %393 = vmatpush2.bf16.msra.mxu1 %v766_v37 }
  0x58   :  { %394 = vmatprep.subr.bf16.mxu1 %v767_v38 }
  0x5b   :  { %395 = vmatpush2.bf16.msra.mxu1 %v769_v39 }
  0xe3   :  { %v121_v55 = vpop.f32.mrf.mxu0 }
  0xe4   :  { %v122_v62 = vadd.f32 %v121_v55, %v64_v57 }
  0xe5   :  { %v123_v58 = vpop.f32.mrf.mxu0 }
  0xe6   :  { %v124_v60 = vadd.f32 %v123_v58, %v68_v56  ;;  %v130_v4 = vmax.f32 %v122_v62, 0.0 }
  0xe7   :  { %v125_v59 = vpop.f32.mrf.mxu0 }
  0xe8   :  { %v126_v61 = vadd.f32 %v125_v59, %v64_v57  ;;  %v131_v2 = vmax.f32 %v124_v60, 0.0 }
  0xe9   :  { %v127_v63 = vpop.f32.mrf.mxu0 }
  0xea   :  { %v128_v0 = vadd.f32 %v127_v63, %v68_v56  ;;  %v132_v1 = vmax.f32 %v126_v61, 0.0 }
  0xec   :  { %v133_v3 = vmax.f32 %v128_v0, 0.0  ;;  %v687_v6 = vpack.c.bf16 %v132_v1, %v130_v4 }
  0xee   :  { %v688_v5 = vpack.c.bf16 %v133_v3, %v131_v2 }
  0xf0   :  { %396 = vmatprep.mubr.bf16.mxu1 %v688_v5 }
  0xf1   :  { %397 = vmatmul.mubr.bf16.vlgmr.msra.gmra.mxu1 %v687_v6 }
 0x1b1   :  { %v398_v14 = vpop.f32.mrf.mxu1 }
 0x1b2   :  { %v399_v21 = vadd.f32 %v398_v14, %v187_v16 }
 0x1b3   :  { %v400_v17 = vpop.f32.mrf.mxu1 }
 0x1b4   :  { %v401_v19 = vadd.f32 %v400_v17, %v191_v15  ;;  %v407_v27 = vmax.f32 %v399_v21, 0.0 }
 0x1b5   :  { %v402_v18 = vpop.f32.mrf.mxu1 }
 0x1b6   :  { %v403_v20 = vadd.f32 %v402_v18, %v187_v16  ;;  %v408_v25 = vmax.f32 %v401_v19, 0.0 }
 0x1b7   :  { %v404_v22 = vpop.f32.mrf.mxu1 }
 0x1b8   :  { %v405_v23 = vadd.f32 %v404_v22, %v191_v15  ;;  %v409_v24 = vmax.f32 %v403_v20, 0.0 }
 0x1ba   :  { %v410_v26 = vmax.f32 %v405_v23, 0.0  ;;  %v689_v29 = vpack.c.bf16 %v409_v24, %v407_v27 }
 0x1bc   :  { %v690_v28 = vpack.c.bf16 %v410_v26, %v408_v25 }
 0x1be   :  { %604 = vmatprep.mubr.bf16.mxu0 %v690_v28 }
 0x1bf   :  { %605 = vmatmul.mubr.bf16.vlgmr.msra.gmra.mxu0 %v689_v29 }
 0x27f   :  { %v707_v30 = vpop.f32.mrf.mxu0 }
 0x281   :  { %v708_v32 = vpop.f32.mrf.mxu0 }
 0x282   :  { %v709_v33 = vadd.f32 %v708_v32, %v707_v30 }
 0x283   :  { %v710_v34 = vpop.f32.mrf.mxu0 }
 0x284   :  { %v607_v35 = vadd.f32 %v709_v33, %v664_v31 }
 0x285   :  { %v711_v36 = vpop.f32.mrf.mxu0 }
 0x286   :  { %614 = vst.msk [vmem:[%s914_s7] sm:$0xff] %vm613_vm2, %v607_v35  ;;  %v712_v37 = vadd.f32 %v711_v36, %v710_v34 }
 0x288   :  { %v610_v38 = vadd.f32 %v712_v37, %v664_v31 }
 0x28a   :  { %615 = vst.msk [vmem:[%s914_s7 + $0x8] sm:$0xff] %vm613_vm2, %v610_v38 }
 0x28b   :  { %620 = vsyncpa [#allocation5], 1 }
 0x28c   :  { %621 = vsyncpa [#allocation7], 1 }

</bundles_post_ra>
